<compile_context>
chip_gen: v5e
topology: v5e:2x2
jax: 0.10.0
libtpu: 0.0.40
codegen_flags: <defaults>
</compile_context>

<pallas_src>
import jax
import jax.numpy as jnp
from jax.experimental import pallas as pl
from jax.experimental.pallas import tpu as pltpu

PRESENT_MAX = 0.9
ABSENT_MIN = 0.1
ABSENT_SCALE = 0.5


def margin_loss_kernel(labels_ref, probs_ref, out_ref):
    """Elementwise margin terms + reduction over the class (sublane) axis.

    labels_ref, probs_ref : (C, TB) tiles in VMEM (batch on lanes)
    out_ref               : (1, TB) float32 tile in VMEM (lane-dense store)
    """
    labels = labels_ref[...]
    probs = probs_ref[...]

    # Elementwise terms in the native input dtype: bf16 inputs stay on the
    # packed bf16 VALU path (v6e/v7x); f32 inputs compute in f32.  All
    # magnitudes are <= 1 so bf16 intermediates are benign; the class-axis
    # reduction below accumulates in f32.
    present = labels * jnp.square(jnp.maximum(PRESENT_MAX - probs, 0.0))
    absent = (1.0 - labels) * jnp.square(jnp.maximum(probs - ABSENT_MIN, 0.0))
    losses = present + ABSENT_SCALE * absent

    # Reduce over classes (sublanes) -> (1, TB) lane-dense store (f32 accum).
    out_ref[...] = jnp.sum(losses.astype(jnp.float32), axis=0, keepdims=True)


def _round_up(x: int, m: int) -> int:
    return ((x + m - 1) // m) * m


def margin_loss_class_major(labels_cm: jax.Array, probs_cm: jax.Array,
                            *, max_tile_b: int = 16384) -> jax.Array:
    """Core kernel entry: class-major (C, B) inputs, returns (B,) float32.

    No wrapper-side copies for B >= 128: inputs are DMA'd straight from HBM in
    their native dtype/layout, partial final blocks are masked by Pallas.
    """
    assert labels_cm.shape == probs_cm.shape
    C, B = labels_cm.shape

    b_eff = B
    if B < 128:
        # Tiny-batch edge case only: pad the lane axis up to one 128-lane tile.
        pad = 128 - B
        labels_cm = jnp.pad(labels_cm, ((0, 0), (0, pad)))
        probs_cm = jnp.pad(probs_cm, ((0, 0), (0, pad)))
        b_eff = 128

    # Lane tile: multiple of 128; >= 2 grid steps when B allows it (two v7x
    # TensorCores on the "parallel" axis); capped so a per-step input block is
    # ~0.5–1 MiB (C=16 f32 -> 1 MiB at 16384 lanes), well inside scoped VMEM.
    tb = min(max_tile_b, max(128, _round_up(pl.cdiv(b_eff, 2), 128)))
    grid = (pl.cdiv(b_eff, tb),)

    out = pl.pallas_call(
        margin_loss_kernel,
        out_shape=jax.ShapeDtypeStruct((1, b_eff), jnp.float32),
        grid=grid,
        in_specs=[
            pl.BlockSpec((C, tb), lambda i: (0, i)),
            pl.BlockSpec((C, tb), lambda i: (0, i)),
        ],
        out_specs=pl.BlockSpec((1, tb), lambda i: (0, i)),
        compiler_params=pltpu.CompilerParams(
            dimension_semantics=("parallel",),
            # Allow XLA to fold operand producers (e.g. the natural-layout
            # wrapper's transposes) into the pallas operands.
            allow_input_fusion=[True, True],
        ),
    )(labels_cm, probs_cm)

    if b_eff != B:
        return out[0, :B]
    return out[0]  # (1, B) -> (B,), free reshape


def margin_loss(labels: jax.Array, digit_probs: jax.Array,
                *, max_tile_b: int = 16384) -> jax.Array:
    """PyTorch-layout entry point: (B, C) labels / digit_probs -> (B,) float32.

    Callers that already hold class-major (C, B) data should call
    `margin_loss_class_major` directly and skip the transposes entirely.
    """
    assert labels.shape == digit_probs.shape
    return margin_loss_class_major(
        jnp.transpose(labels), jnp.transpose(digit_probs), max_tile_b=max_tile_b)


def margin_loss_ref(labels, digit_probs):
    """Pure-JAX reference mirroring the PyTorch forward."""
    labels = labels.astype(jnp.float32)
    digit_probs = digit_probs.astype(jnp.float32)
    zeros = jnp.zeros_like(labels, dtype=jnp.float32)
    present = labels * jnp.square(jnp.maximum(zeros, PRESENT_MAX - digit_probs))
    absent = (1.0 - labels) * jnp.square(jnp.maximum(zeros, digit_probs - ABSENT_MIN))
    losses = present + ABSENT_SCALE * absent
    return jnp.sum(losses, axis=-1)


if __name__ == "__main__":
    key = jax.random.PRNGKey(0)
    k1, k2 = jax.random.split(key)

    # Small primary case: one-hot labels over 16 capsule classes, f32 path.
    B, C = 8, 16
    class_ids = jax.random.randint(k1, (B,), 0, C)
    labels = jax.nn.one_hot(class_ids, C, dtype=jnp.float32)
    digit_probs = jax.random.uniform(k2, (B, C), dtype=jnp.float32)

    out = jax.block_until_ready(margin_loss(labels, digit_probs))
    ref = margin_loss_ref(labels, digit_probs)
    assert out.shape == (B,), out.shape
    assert jnp.allclose(out, ref, atol=1e-5, rtol=1e-5), (out, ref)

    # Partial-block path requested by the review: B % tb != 0, NO padding, and
    # bf16 inputs (bf16 elementwise compute in-kernel, f32 reduction) —
    # tolerance loosened accordingly for the bf16 intermediates.
    B2 = 300
    k3, k4 = jax.random.split(k2)
    class_ids2 = jax.random.randint(k3, (B2,), 0, C)
    labels2 = jax.nn.one_hot(class_ids2, C, dtype=jnp.bfloat16)
    probs2 = jax.random.uniform(k4, (B2, C), dtype=jnp.float32).astype(jnp.bfloat16)
    out2 = jax.block_until_ready(margin_loss(labels2, probs2))
    ref2 = margin_loss_ref(labels2, probs2)
    assert out2.shape == (B2,), out2.shape
    assert jnp.allclose(out2, ref2, atol=5e-2, rtol=3e-2), (out2, ref2)

    # Class-major fast path (zero wrapper-side data movement).
    out3 = jax.block_until_ready(
        margin_loss_class_major(jnp.transpose(labels), jnp.transpose(digit_probs)))
    assert jnp.allclose(out3, ref, atol=1e-5, rtol=1e-5), (out3, ref)

    print("KERNEL_OK")
</pallas_src>

<mosaic_0001>
module attributes {stable_mosaic.version = 11 : i64} {
  func.func @margin_loss_kernel(%arg0: i32, %arg1: memref<16x128xf32, #tpu.memory_space<vmem>>, %arg2: memref<16x128xf32, #tpu.memory_space<vmem>>, %arg3: memref<1x128xf32, #tpu.memory_space<vmem>>) attributes {dimension_semantics = [#tpu.dimension_semantics<parallel>], iteration_bounds = array<i64: 1>, scalar_prefetch = 0 : i64, scratch_operands = 0 : i64, tpu.core_type = #tpu.core_type<tc>, window_params = [{transform_indices = @transform_0, window_bounds = array<i64: 16, 128>}, {transform_indices = @transform_1, window_bounds = array<i64: 16, 128>}, {transform_indices = @transform_2, window_bounds = array<i64: 1, 128>}]} {
    %c0 = arith.constant 0 : index
    %c0_0 = arith.constant 0 : index
    %0 = vector.load %arg1[%c0, %c0_0] : memref<16x128xf32, #tpu.memory_space<vmem>>, vector<16x128xf32>
    %c0_1 = arith.constant 0 : index
    %c0_2 = arith.constant 0 : index
    %1 = vector.load %arg2[%c0_1, %c0_2] : memref<16x128xf32, #tpu.memory_space<vmem>>, vector<16x128xf32>
    %cst = arith.constant 0.899999976 : f32
    %2 = vector.broadcast %cst : f32 to vector<16x128xf32>
    %3 = arith.subf %2, %1 : vector<16x128xf32>
    %cst_3 = arith.constant 0.000000e+00 : f32
    %4 = vector.broadcast %cst_3 : f32 to vector<16x128xf32>
    %5 = arith.maximumf %3, %4 : vector<16x128xf32>
    %6 = arith.mulf %5, %5 : vector<16x128xf32>
    %7 = arith.mulf %0, %6 : vector<16x128xf32>
    %cst_4 = arith.constant 1.000000e+00 : f32
    %8 = vector.broadcast %cst_4 : f32 to vector<16x128xf32>
    %9 = arith.subf %8, %0 : vector<16x128xf32>
    %cst_5 = arith.constant 1.000000e-01 : f32
    %10 = vector.broadcast %cst_5 : f32 to vector<16x128xf32>
    %11 = arith.subf %1, %10 : vector<16x128xf32>
    %cst_6 = arith.constant 0.000000e+00 : f32
    %12 = vector.broadcast %cst_6 : f32 to vector<16x128xf32>
    %13 = arith.maximumf %11, %12 : vector<16x128xf32>
    %14 = arith.mulf %13, %13 : vector<16x128xf32>
    %15 = arith.mulf %9, %14 : vector<16x128xf32>
    %cst_7 = arith.constant 5.000000e-01 : f32
    %16 = vector.broadcast %cst_7 : f32 to vector<16x128xf32>
    %17 = arith.mulf %16, %15 : vector<16x128xf32>
    %18 = arith.addf %7, %17 : vector<16x128xf32>
    %cst_8 = arith.constant dense<0.000000e+00> : vector<128xf32>
    %19 = vector.multi_reduction <add>, %18, %cst_8 [0] : vector<16x128xf32> to vector<128xf32>
    %20 = vector.shape_cast %19 : vector<128xf32> to vector<1x128xf32>
    %c0_9 = arith.constant 0 : index
    %c0_10 = arith.constant 0 : index
    %21 = vector.load %arg3[%c0_9, %c0_10] : memref<1x128xf32, #tpu.memory_space<vmem>>, vector<1x128xf32>
    tpu.vector_store %arg3[%c0_9, %c0_10], %20 {strides = array<i32>} : memref<1x128xf32, #tpu.memory_space<vmem>>, vector<1x128xf32>,
    return
  }
  func.func @transform_0(%arg0: i32) -> (i32, i32) {
    %c0_i32 = arith.constant 0 : i32
    %c0_i32_0 = arith.constant 0 : i32
    return %c0_i32, %arg0 : i32, i32
  }
  func.func @transform_1(%arg0: i32) -> (i32, i32) {
    %c0_i32 = arith.constant 0 : i32
    %c0_i32_0 = arith.constant 0 : i32
    return %c0_i32, %arg0 : i32, i32
  }
  func.func @transform_2(%arg0: i32) -> (i32, i32) {
    %c0_i32 = arith.constant 0 : i32
    %c0_i32_0 = arith.constant 0 : i32
    return %c0_i32, %arg0 : i32, i32
  }
}

</mosaic_0001>

<bundles_post_ra>
// kernel: tpu_custom_call.1
= control target key start
LH: loop header
LB: loop body
LE: loop exit
PB: predicated region body
PF: predicated region fallthrough
CT: control target
= control target key end

     0   :  { %7 = vsyncpa [#allocation3], 0  ;;  %s210_s0 = inlined_call_operand.hbm [shape: f32[16,128], index: 0, kind: input, shape index: {}]   ;;  %s211_s1 = inlined_call_operand.hbm [shape: f32[16,128], index: 1, kind: input, shape index: {}]   ;;  %s212_s2 = inlined_call_operand.hbm [shape: f32[1,128], index: 2, kind: output, shape index: {}]  }
   0x1   :  { %8 = vsyncpa [#allocation6], 0 }
   0x2   :  { %9 = vsyncpa [#allocation4], 0  ;;  %s14_s11 = sshll.u32 %s210_s0, 4  ;;  %s181_s12 = smov [#allocation2]   ;;  %s15_s11 = int_to_ptr.hbm [resolvable:$true] %s14_s11 }
   0x3   :  { %s16_s13 = sshll.u32 %s181_s12, 4  ;;  %s27_s16 = sshll.u32 %s211_s1, 4  ;;  %s17_s13 = int_to_ptr.vmem [resolvable:$true] %s16_s13  ;;  %s28_s16 = int_to_ptr.hbm [resolvable:$true] %s27_s16 }
   0x4   :  { %s182_s17 = smov 128   ;;  %s183_s18 = smov 8  }
   0x5   :  { %22 = dma.hbm_to_vmem [thread:$0]  %s15_s11, 256, %s17_s13, [#allocation3], %s182_s17, %s182_s17, %s183_s18  }
   0x6   :  { %s184_s19 = smov [#allocation5]  }
   0x7   :  { %s29_s20 = sshll.u32 %s184_s19, 4  ;;  %s30_s20 = int_to_ptr.vmem [resolvable:$true] %s29_s20 }
   0x8   :  { %35 = dma.hbm_to_vmem [thread:$0]  %s28_s16, 256, %s30_s20, [#allocation6], %s182_s17, %s182_s17, %s183_s18  }
   0x9   :  { %175 = dma.done.wait [#allocation3], 256  }
   0xa   :  { %176 = vsyncadd [#allocation3], 4294967040 }
   0xb   :  { %177 = dma.done.wait [#allocation6], 256  }
   0xc   :  { %178 = vsyncadd [#allocation6], 4294967040  ;;  %v44_v0 = vld [vmem:[#allocation2] sm:$0xff]  ;;  %v46_v1 = vld [vmem:[#allocation5] sm:$0xff]  ;;  %s185_s0 = smov [#allocation7]   ;;  %s85_s23 = sshll.u32 %s212_s2, 4  ;;  %s86_s23 = int_to_ptr.hbm [resolvable:$true] %s85_s23 }
   0xd   :  { %v45_v2 = vld [vmem:[#allocation2 + $0x8] sm:$0xff]  ;;  %v47_v3 = vld [vmem:[#allocation5 + $0x8] sm:$0xff]  ;;  %v48_v4 = vsub.f32 0.9, %v46_v1  ;;  %v96_v6 = vadd.f32 -0.1, %v46_v1 }
   0xe   :  { %v49_v5 = vsub.f32 0.9, %v47_v3  ;;  %v97_v7 = vadd.f32 -0.1, %v47_v3  ;;  %v56_v9 = vsub.f32 1.0, %v44_v0  ;;  %v57_v11 = vsub.f32 1.0, %v45_v2 }
   0xf   :  { %v50_v8 = vmax.f32 %v48_v4, 0.0  ;;  %v60_v12 = vmax.f32 %v96_v6, 0.0  ;;  %s83_s1 = sshll.u32 %s185_s0, 4  ;;  %s84_s1 = int_to_ptr.vmem [resolvable:$true] %s83_s1 }
  0x10   :  { %v51_v10 = vmax.f32 %v49_v5, 0.0  ;;  %v61_v13 = vmax.f32 %v97_v7, 0.0 }
  0x11   :  { %v52_v14 = vmul.f32 %v50_v8, %v50_v8  ;;  %v62_v16 = vmul.f32 %v60_v12, %v60_v12 }
  0x12   :  { %v53_v15 = vmul.f32 %v51_v10, %v51_v10  ;;  %v63_v17 = vmul.f32 %v61_v13, %v61_v13 }
  0x13   :  { %v54_v18 = vmul.f32 %v52_v14, %v44_v0  ;;  %v64_v20 = vmul.f32 %v62_v16, %v56_v9 }
  0x14   :  { %v55_v19 = vmul.f32 %v53_v15, %v45_v2  ;;  %v65_v21 = vmul.f32 %v63_v17, %v57_v11 }
  0x15   :  { %v66_v22 = vmul.f32 0.5, %v64_v20 }
  0x16   :  { %v67_v23 = vmul.f32 0.5, %v65_v21 }
  0x17   :  { %v68_v24 = vadd.f32 %v66_v22, %v54_v18 }
  0x18   :  { %v69_v25 = vadd.f32 %v67_v23, %v55_v19 }
  0x1a   :  { %v70_v26 = vadd.f32 %v69_v25, %v68_v24 }
  0x1c   :  { %v71_v27 = vrot.slane %v70_v26, 4 }
  0x1e   :  { %v72_v28 = vadd.f32 %v71_v27, %v70_v26 }
  0x20   :  { %v73_v29 = vrot.slane %v72_v28, 2 }
  0x22   :  { %v74_v30 = vadd.f32 %v73_v29, %v72_v28 }
  0x24   :  { %v75_v31 = vrot.slane %v74_v30, 1 }
  0x26   :  { %v76_v32 = vadd.f32 %v75_v31, %v74_v30 }
  0x28   :  { %77 = vst [vmem:[#allocation7] sm:$0x1] %v76_v32 }
  0x29   :  { %88 = dma.vmem_to_hbm [thread:$0]  %s84_s1, 16, %s86_s23, [#allocation4]  }
  0x2a   :  { %179 = dma.done.wait [#allocation4], 16  }
  0x2b   :  { %180 = vsyncadd [#allocation4], 4294967280 }
  0x2c   :  { %93 = vsyncpa [#allocation3], 1 }
  0x2d   :  { %94 = vsyncpa [#allocation6], 1 }
  0x2e   :  { %95 = vsyncpa [#allocation4], 1 }

</bundles_post_ra>
